<compile_context>
chip_gen: v7x
topology: tpu7x:2x2x1
jax: 0.10.0
libtpu: 0.0.40
codegen_flags: <defaults>
</compile_context>

<pallas_src>
import jax
import jax.numpy as jnp
from jax.experimental import pallas as pl
from jax.experimental.pallas import tpu as pltpu


_DEFAULT_CHUNK_ROWS = 512      # rows per sweep-chunk inside the fused kernel body
_TWO_PASS_TILE_ROWS = 2048     # target rows per tile for the two-pass streaming path


def _vmem_budget_bytes():
    """Scoped-VMEM request, sized per TPU generation (conservative fallback)."""
    cap = None
    try:
        info = pltpu.get_tpu_info()
        cap = int(getattr(info, "vmem_capacity_bytes", 0)) or None
    except Exception:
        cap = None
    if cap is None:
        return 32 * 1024 * 1024            # unknown backend / interpret mode
    if cap <= 64 * 1024 * 1024:            # v7x-class core (64 MiB physical VMEM)
        return 48 * 1024 * 1024
    return 96 * 1024 * 1024                # v5e / v6e (128 MiB physical VMEM)


def _sublane_pack(dtype):
    # 8 rows for 4-byte dtypes, 16 for bf16, 32 for int8/fp8.
    return max(8, 32 // jnp.dtype(dtype).itemsize)


# ----------------------------------------------------------------------------
# Fused single-pass kernel: whole (R, lane_width) slab of one batch element
# resident in VMEM, two chunked sweeps (reduce, then apply).
# ----------------------------------------------------------------------------

def _make_fused_kernel(C, lane_width, R, chunk_rows):
    rep = lane_width // C
    chunk = min(chunk_rows, R)
    n_full = R // chunk
    tail = R - n_full * chunk

    def kernel(x_ref, gamma_ref, beta_ref, fold_ref, o_ref):
        # ---- sweep 1: per-lane sum of squares over the row (sublane) axis ----
        def ss_of(start, rows):
            xf = x_ref[pl.ds(start, rows), :].astype(jnp.float32)
            return jnp.sum(xf * xf, axis=0, keepdims=True)          # (1, lane_width)

        lane_ss = jnp.zeros((1, lane_width), jnp.float32)
        if n_full > 0:
            def body1(i, acc):
                start = pl.multiple_of(i * chunk, chunk)
                return acc + ss_of(start, chunk)
            lane_ss = jax.lax.fori_loop(0, n_full, body1, lane_ss)
        if tail > 0:
            lane_ss = lane_ss + ss_of(n_full * chunk, tail)

        # ---- fold lanes of the same channel (lane % C), replicated back ------
        if rep > 1:
            ch_ss = jnp.dot(lane_ss, fold_ref[...],
                            preferred_element_type=jnp.float32,
                            precision=jax.lax.Precision.HIGHEST)
        else:
            ch_ss = lane_ss

        gx = jnp.sqrt(ch_ss)                                          # (1, lane_width)
        # Each channel appears `rep` times, so the lane mean equals the channel mean.
        nx = gx / (jnp.mean(gx, axis=-1, keepdims=True) + 1e-6)
        a = gamma_ref[...].astype(jnp.float32) * nx + 1.0             # (1, lane_width)
        b = beta_ref[...].astype(jnp.float32)                         # (1, lane_width)

        # ---- sweep 2: out = x * a + b ----------------------------------------
        def apply_at(start, rows):
            xf = x_ref[pl.ds(start, rows), :].astype(jnp.float32)
            o_ref[pl.ds(start, rows), :] = (xf * a + b).astype(o_ref.dtype)

        if n_full > 0:
            def body2(i, carry):
                start = pl.multiple_of(i * chunk, chunk)
                apply_at(start, chunk)
                return carry
            jax.lax.fori_loop(0, n_full, body2, 0)
        if tail > 0:
            apply_at(n_full * chunk, tail)

    return kernel


def _grn_fused(x3, gamma_l, beta_l, fold, C, vmem_limit, chunk_rows):
    N, R, lw = x3.shape
    kernel = _make_fused_kernel(C, lw, R, chunk_rows)
    return pl.pallas_call(
        kernel,
        out_shape=jax.ShapeDtypeStruct((N, R, lw), x3.dtype),
        grid_spec=pltpu.PrefetchScalarGridSpec(
            num_scalar_prefetch=0,
            grid=(N,),
            in_specs=[
                pl.BlockSpec((pl.Squeezed(), R, lw), lambda n: (n, 0, 0)),
                pl.BlockSpec((1, lw), lambda n: (0, 0)),
                pl.BlockSpec((1, lw), lambda n: (0, 0)),
                pl.BlockSpec(fold.shape, lambda n: (0, 0)),
            ],
            out_specs=pl.BlockSpec((pl.Squeezed(), R, lw), lambda n: (n, 0, 0)),
        ),
        compiler_params=pltpu.CompilerParams(
            dimension_semantics=("parallel",),
            vmem_limit_bytes=vmem_limit,
        ),
    )(x3, gamma_l, beta_l, fold)


# ----------------------------------------------------------------------------
# Two-pass streaming path for slabs that do not fit the fused VMEM budget.
# ----------------------------------------------------------------------------

def _make_sumsq_kernel(tile_rows, R, ragged):
    def kernel(x_ref, ss_ref):
        k = pl.program_id(1)

        @pl.when(k == 0)
        def _():
            ss_ref[...] = jnp.zeros_like(ss_ref)

        xf = x_ref[...].astype(jnp.float32)
        if ragged:
            # Last tile may read past the end of the array; mask invalid rows.
            valid = R - k * tile_rows
            rows = jax.lax.broadcasted_iota(jnp.int32, xf.shape, 0)
            xf = jnp.where(rows < valid, xf, 0.0)
        ss_ref[...] += jnp.sum(xf * xf, axis=0, keepdims=True)

    return kernel


def _apply_kernel(x_ref, a_ref, b_ref, o_ref):
    # out = x * a + b  with a = gamma*nx + 1 and b = beta, both per-lane.
    xf = x_ref[...].astype(jnp.float32)
    o_ref[...] = (xf * a_ref[...] + b_ref[...]).astype(o_ref.dtype)


def _pick_tile_rows(R, pack, cap=_TWO_PASS_TILE_ROWS):
    """Rows per tile: large (>=~512), multiple of the sublane packing, exact if possible."""
    if R <= cap:
        return R, 1, False                       # single full-extent tile
    t = cap - (cap % pack)
    while t >= max(pack, 256):
        if R % t == 0:
            return t, R // t, False              # exact tiling
        t -= pack
    t = cap - (cap % pack)
    return t, pl.cdiv(R, t), True                # ragged: mask the tail in pass 1


def _grn_two_pass(x3, gamma_l, beta_l, C, vmem_limit, tile_rows=None):
    N, R, lw = x3.shape
    rep = lw // C
    pack = _sublane_pack(x3.dtype)
    if tile_rows is None:
        tile_rows, nk, ragged = _pick_tile_rows(R, pack)
    else:
        nk = pl.cdiv(R, tile_rows)
        ragged = (R % tile_rows) != 0

    # Pass 1: per-(batch, lane) sum of squares, accumulated across row tiles.
    ss = pl.pallas_call(
        _make_sumsq_kernel(tile_rows, R, ragged),
        out_shape=jax.ShapeDtypeStruct((N, 1, lw), jnp.float32),
        grid_spec=pltpu.PrefetchScalarGridSpec(
            num_scalar_prefetch=0,
            grid=(N, nk),
            in_specs=[pl.BlockSpec((pl.Squeezed(), tile_rows, lw),
                                   lambda n, k: (n, k, 0))],
            out_specs=pl.BlockSpec((pl.Squeezed(), 1, lw), lambda n, k: (n, 0, 0)),
        ),
        compiler_params=pltpu.CompilerParams(
            dimension_semantics=("parallel", "arbitrary"),
            vmem_limit_bytes=vmem_limit,
        ),
    )(x3)

    # Tiny O(N*C) epilogue in plain JAX: fold lanes -> channels, build per-lane
    # affine coefficients a = gamma*nx + 1 (lane-tiled) and b = beta.
    ch = ss.reshape(N, rep, C).sum(axis=1)                           # (N, C)
    gx = jnp.sqrt(ch)
    nx = gx / (jnp.mean(gx, axis=-1, keepdims=True) + 1e-6)          # (N, C)
    nx_lane = jnp.tile(nx, (1, rep))                                 # (N, lw)
    a = (gamma_l.astype(jnp.float32) * nx_lane + 1.0).reshape(N, 1, lw)
    b = beta_l.astype(jnp.float32).reshape(1, 1, lw)

    # Pass 2: elementwise apply, fully parallel over (batch, row-tile).
    return pl.pallas_call(
        _apply_kernel,
        out_shape=jax.ShapeDtypeStruct((N, R, lw), x3.dtype),
        grid_spec=pltpu.PrefetchScalarGridSpec(
            num_scalar_prefetch=0,
            grid=(N, nk),
            in_specs=[
                pl.BlockSpec((pl.Squeezed(), tile_rows, lw), lambda n, k: (n, k, 0)),
                pl.BlockSpec((pl.Squeezed(), 1, lw), lambda n, k: (n, 0, 0)),
                pl.BlockSpec((pl.Squeezed(), 1, lw), lambda n, k: (0, 0, 0)),
            ],
            out_specs=pl.BlockSpec((pl.Squeezed(), tile_rows, lw),
                                   lambda n, k: (n, k, 0)),
        ),
        compiler_params=pltpu.CompilerParams(
            dimension_semantics=("parallel", "parallel"),
            vmem_limit_bytes=vmem_limit,
        ),
    )(x3, a, b)


# ----------------------------------------------------------------------------
# Public wrapper
# ----------------------------------------------------------------------------

def grn_pallas(x, gamma, beta, *, force_path=None, tile_rows=None, chunk_rows=None):
    """GRN forward. x: (N, H, W, C); gamma, beta: broadcastable to (1, 1, 1, C)."""
    N, H, W, C = x.shape
    HW = H * W

    # Lane-dense view: (HW, C) -> (R, 128) is a free row-major reshape whenever
    # 128 % C == 0 and HW*C % 128 == 0; lane l then holds channel (l % C).
    lane_dense = (C <= 128) and (128 % C == 0) and ((HW * C) % 128 == 0)
    lane_width = 128 if lane_dense else C
    rep = lane_width // C
    R = (HW * C) // lane_width

    x3 = x.reshape(N, R, lane_width)
    gamma_l = jnp.tile(jnp.reshape(gamma, (1, C)), (1, rep))        # (1, lane_width)
    beta_l = jnp.tile(jnp.reshape(beta, (1, C)), (1, rep))          # (1, lane_width)

    # 0/1 matrix folding lanes with equal (lane % C); identity when rep == 1.
    lanes = jnp.arange(lane_width)
    fold = (lanes[:, None] % C == lanes[None, :] % C).astype(jnp.float32)

    vmem_limit = _vmem_budget_bytes()
    slab_bytes = R * lane_width * jnp.dtype(x.dtype).itemsize
    # Fused residency ~ 2x in + 2x out double buffers (kernel body is chunked).
    fits_fused = 4 * slab_bytes + (8 << 20) <= vmem_limit

    path = force_path or ("fused" if fits_fused else "two_pass")
    if path == "fused":
        out3 = _grn_fused(x3, gamma_l, beta_l, fold, C, vmem_limit,
                          chunk_rows or _DEFAULT_CHUNK_ROWS)
    elif path == "two_pass":
        out3 = _grn_two_pass(x3, gamma_l, beta_l, C, vmem_limit, tile_rows)
    else:
        raise ValueError(f"unknown path {path!r}")

    return out3.reshape(N, H, W, C)


def grn_reference(x, gamma, beta):
    """Pure-JAX reference matching the PyTorch forward exactly."""
    gx = jnp.sqrt(jnp.sum(jnp.square(x.astype(jnp.float32)), axis=(1, 2), keepdims=True))
    nx = gx / (jnp.mean(gx, axis=-1, keepdims=True) + 1e-6)
    return (gamma * (x * nx) + beta + x).astype(x.dtype)


def _check(got, want, name, atol=1e-5, rtol=1e-5):
    assert got.shape == want.shape, f"{name}: shape {got.shape} != {want.shape}"
    assert jnp.allclose(got, want, atol=atol, rtol=rtol), f"{name}: value mismatch"


if __name__ == "__main__":
    key = jax.random.PRNGKey(0)
    kx, kg, kb = jax.random.split(key, 3)

    # Main shape: small NHWC input, dim = C = 4 (ConvNeXt GRN layout).
    N, H, W, C = 2, 16, 16, 4
    x = jax.random.normal(kx, (N, H, W, C), dtype=jnp.float32)
    # The PyTorch module initializes gamma/beta to zeros (forward == identity-ish);
    # use deterministic non-zero values so the normalization path is exercised.
    gamma = 0.1 * jax.random.normal(kg, (1, 1, 1, C), dtype=jnp.float32)
    beta = 0.1 * jax.random.normal(kb, (1, 1, 1, C), dtype=jnp.float32)

    ref = grn_reference(x, gamma, beta)
    out = jax.block_until_ready(grn_pallas(x, gamma, beta))          # lane-dense fused
    _check(out, ref, "fused(lane-dense)")

    # Fused path with the chunked two-sweep body exercised (R=16, 8-row chunks).
    x2 = jax.random.normal(kx, (2, 16, 32, C), dtype=jnp.float32)
    ref2 = grn_reference(x2, gamma, beta)
    out2 = jax.block_until_ready(
        grn_pallas(x2, gamma, beta, force_path="fused", chunk_rows=8))
    _check(out2, ref2, "fused(chunked)")

    # Two-pass path, exact tiling (R=16 -> two 8-row tiles).
    out3 = jax.block_until_ready(
        grn_pallas(x2, gamma, beta, force_path="two_pass", tile_rows=8))
    _check(out3, ref2, "two_pass(exact)")

    # Two-pass path, ragged last tile (R=12 -> 8-row tiles, 4 valid rows in the last).
    x_r = jax.random.normal(kb, (2, 16, 24, C), dtype=jnp.float32)
    ref_r = grn_reference(x_r, gamma, beta)
    out4 = jax.block_until_ready(
        grn_pallas(x_r, gamma, beta, force_path="two_pass", tile_rows=8))
    _check(out4, ref_r, "two_pass(ragged)")

    # Non-lane-dense fallback (C does not divide 128).
    C2 = 6
    x4 = jax.random.normal(kx, (2, 8, 8, C2), dtype=jnp.float32)
    g4 = 0.1 * jax.random.normal(kg, (1, 1, 1, C2), dtype=jnp.float32)
    b4 = 0.1 * jax.random.normal(kb, (1, 1, 1, C2), dtype=jnp.float32)
    ref4 = grn_reference(x4, g4, b4)
    out5 = jax.block_until_ready(grn_pallas(x4, g4, b4))
    _check(out5, ref4, "fused(generic C=6)")

    print("KERNEL_OK")
</pallas_src>

<mosaic_0001>
module attributes {stable_mosaic.version = 11 : i64} {
  func.func @kernel(%arg0: i32, %arg1: memref<1x8x128xf32, #tpu.memory_space<vmem>>, %arg2: memref<1x128xf32, #tpu.memory_space<vmem>>, %arg3: memref<1x128xf32, #tpu.memory_space<vmem>>, %arg4: memref<128x128xf32, #tpu.memory_space<vmem>>, %arg5: memref<1x8x128xf32, #tpu.memory_space<vmem>>) attributes {dimension_semantics = [#tpu.dimension_semantics<parallel>], iteration_bounds = array<i64: 2>, scalar_prefetch = 0 : i64, scratch_operands = 0 : i64, tpu.core_type = #tpu.core_type<tc>, window_params = [{transform_indices = @transform_0, window_bounds = array<i64: 1, 8, 128>}, {pipeline_mode = #tpu.pipeline_mode<synchronous>, transform_indices = @transform_1, window_bounds = array<i64: 1, 128>}, {pipeline_mode = #tpu.pipeline_mode<synchronous>, transform_indices = @transform_2, window_bounds = array<i64: 1, 128>}, {pipeline_mode = #tpu.pipeline_mode<synchronous>, transform_indices = @transform_3, window_bounds = array<i64: 128, 128>}, {transform_indices = @transform_4, window_bounds = array<i64: 1, 8, 128>}]} {
    %cst = arith.constant 0.000000e+00 : f32
    %0 = vector.broadcast %cst : f32 to vector<1x128xf32>
    %c0_i32 = arith.constant 0 : i32
    %c8_i32 = arith.constant 8 : i32
    %1 = arith.muli %c0_i32, %c8_i32 : i32
    %2 = tpu.assume_multiple %1, 8 : i32
    %c0 = arith.constant 0 : index
    %3 = arith.index_cast %2 : i32 to index
    %c0_0 = arith.constant 0 : index
    %4 = vector.load %arg1[%c0, %3, %c0_0] : memref<1x8x128xf32, #tpu.memory_space<vmem>>, vector<1x8x128xf32>
    %5 = vector.shape_cast %4 : vector<1x8x128xf32> to vector<8x128xf32>
    %6 = arith.mulf %5, %5 : vector<8x128xf32>
    %cst_1 = arith.constant dense<0.000000e+00> : vector<128xf32>
    %7 = vector.multi_reduction <add>, %6, %cst_1 [0] : vector<8x128xf32> to vector<128xf32>
    %8 = vector.shape_cast %7 : vector<128xf32> to vector<1x128xf32>
    %9 = arith.addf %0, %8 : vector<1x128xf32>
    %c1_i32 = arith.constant 1 : i32
    %c0_2 = arith.constant 0 : index
    %c0_3 = arith.constant 0 : index
    %10 = vector.load %arg4[%c0_2, %c0_3] : memref<128x128xf32, #tpu.memory_space<vmem>>, vector<128x128xf32>
    %cst_4 = arith.constant dense<0.000000e+00> : vector<1x128xf32>
    %11 = tpu.matmul %9, %10, %cst_4 {dimension_numbers = #tpu.dot_dimension_numbers<[1], [0], [0], [1], [0, 0, 1, 1], [], []>, precision = #tpu.contract_precision<fp32>} : vector<1x128xf32>, vector<128x128xf32>, vector<1x128xf32> -> vector<1x128xf32>
    %12 = math.sqrt %11 : vector<1x128xf32>
    %cst_5 = arith.constant dense<0.000000e+00> : vector<1xf32>
    %13 = vector.multi_reduction <add>, %12, %cst_5 [1] : vector<1x128xf32> to vector<1xf32>
    %14 = vector.shape_cast %13 : vector<1xf32> to vector<1x1xf32>
    %cst_6 = arith.constant 1.280000e+02 : f32
    %15 = vector.broadcast %cst_6 : f32 to vector<1x1xf32>
    %16 = arith.divf %14, %15 : vector<1x1xf32>
    %cst_7 = arith.constant 9.99999997E-7 : f32
    %17 = vector.broadcast %cst_7 : f32 to vector<1x1xf32>
    %18 = arith.addf %16, %17 : vector<1x1xf32>
    %19 = vector.broadcast %18 : vector<1x1xf32> to vector<1x128xf32>
    %20 = arith.divf %12, %19 : vector<1x128xf32>
    %c0_8 = arith.constant 0 : index
    %c0_9 = arith.constant 0 : index
    %21 = vector.load %arg2[%c0_8, %c0_9] : memref<1x128xf32, #tpu.memory_space<vmem>>, vector<1x128xf32>
    %22 = arith.mulf %21, %20 : vector<1x128xf32>
    %cst_10 = arith.constant 1.000000e+00 : f32
    %23 = vector.broadcast %cst_10 : f32 to vector<1x128xf32>
    %24 = arith.addf %22, %23 : vector<1x128xf32>
    %c0_11 = arith.constant 0 : index
    %c0_12 = arith.constant 0 : index
    %25 = vector.load %arg3[%c0_11, %c0_12] : memref<1x128xf32, #tpu.memory_space<vmem>>, vector<1x128xf32>
    %c0_i32_13 = arith.constant 0 : i32
    %c8_i32_14 = arith.constant 8 : i32
    %26 = arith.muli %c0_i32_13, %c8_i32_14 : i32
    %27 = tpu.assume_multiple %26, 8 : i32
    %c0_15 = arith.constant 0 : index
    %28 = arith.index_cast %27 : i32 to index
    %c0_16 = arith.constant 0 : index
    %29 = vector.load %arg1[%c0_15, %28, %c0_16] : memref<1x8x128xf32, #tpu.memory_space<vmem>>, vector<1x8x128xf32>
    %30 = vector.shape_cast %29 : vector<1x8x128xf32> to vector<8x128xf32>
    %31 = vector.broadcast %24 : vector<1x128xf32> to vector<8x128xf32>
    %32 = arith.mulf %30, %31 : vector<8x128xf32>
    %33 = vector.broadcast %25 : vector<1x128xf32> to vector<8x128xf32>
    %34 = arith.addf %32, %33 : vector<8x128xf32>
    %c0_17 = arith.constant 0 : index
    %35 = arith.index_cast %27 : i32 to index
    %c0_18 = arith.constant 0 : index
    %36 = vector.load %arg5[%c0_17, %35, %c0_18] : memref<1x8x128xf32, #tpu.memory_space<vmem>>, vector<1x8x128xf32>
    %37 = vector.shape_cast %36 : vector<1x8x128xf32> to vector<8x128xf32>
    %38 = vector.shape_cast %34 : vector<8x128xf32> to vector<1x8x128xf32>
    tpu.vector_store %arg5[%c0_17, %35, %c0_18], %38 {strides = array<i32>} : memref<1x8x128xf32, #tpu.memory_space<vmem>>, vector<1x8x128xf32>,
    %c1_i32_19 = arith.constant 1 : i32
    return
  }
  func.func @transform_0(%arg0: i32) -> (i32, i32, i32) {
    %c0_i32 = arith.constant 0 : i32
    %c0_i32_0 = arith.constant 0 : i32
    %c0_i32_1 = arith.constant 0 : i32
    return %arg0, %c0_i32, %c0_i32_0 : i32, i32, i32
  }
  func.func @transform_1(%arg0: i32) -> (i32, i32) {
    %c0_i32 = arith.constant 0 : i32
    %c0_i32_0 = arith.constant 0 : i32
    %c0_i32_1 = arith.constant 0 : i32
    return %c0_i32, %c0_i32_0 : i32, i32
  }
  func.func @transform_2(%arg0: i32) -> (i32, i32) {
    %c0_i32 = arith.constant 0 : i32
    %c0_i32_0 = arith.constant 0 : i32
    %c0_i32_1 = arith.constant 0 : i32
    return %c0_i32, %c0_i32_0 : i32, i32
  }
  func.func @transform_3(%arg0: i32) -> (i32, i32) {
    %c0_i32 = arith.constant 0 : i32
    %c0_i32_0 = arith.constant 0 : i32
    %c0_i32_1 = arith.constant 0 : i32
    return %c0_i32, %c0_i32_0 : i32, i32
  }
  func.func @transform_4(%arg0: i32) -> (i32, i32, i32) {
    %c0_i32 = arith.constant 0 : i32
    %c0_i32_0 = arith.constant 0 : i32
    %c0_i32_1 = arith.constant 0 : i32
    return %arg0, %c0_i32, %c0_i32_0 : i32, i32, i32
  }
}

</mosaic_0001>

<bundles_post_ra>
// kernel: tpu_custom_call.1
= control target key start
LH: loop header
LB: loop body
LE: loop exit
PB: predicated region body
PF: predicated region fallthrough
CT: control target
= control target key end

     0   :  { %9 = vsyncpa [#allocation3], 0  ;;  %s2209_s0 = inlined_call_operand.hbm [shape: f32[2,8,128], index: 0, kind: input, shape index: {}]   ;;  %s2210_s1 = inlined_call_operand.vmem [shape: f32[1,128], index: 1, kind: input, shape index: {}]   ;;  %s2211_s2 = inlined_call_operand.vmem [shape: f32[1,128], index: 2, kind: input, shape index: {}]   ;;  %s2212_s3 = inlined_call_operand.hbm [shape: f32[128,128], index: 3, kind: input, shape index: {}]   ;;  %s2213_s4 = inlined_call_operand.hbm [shape: f32[2,8,128], index: 4, kind: output, shape index: {}]  }
   0x1   :  { %11 = vsyncpa [#allocation3 + $0x1], 0 }
   0x2   :  { %12 = vsyncpa [#allocation6], 0 }
   0x3   :  { %13 = vsyncpa [#allocation4], 0 }
   0x4   :  { %15 = vsyncpa [#allocation4 + $0x1], 0  ;;  %s1732_s15 = smov 0   ;;  %s1734_s16 = smov 0  }
   0x5   :  { %s1736_s17 = smov 0   ;;  %s1738_s18 = smov 0  }
   0x6 LB: > { %s1753_s19 = sadd.s32 4294967295, %s1697_s18   ;;  %s1023_s20 = sadd.s32 4294967294, %s1697_s18   ;;  %s1697_s18 = sphi %s1738_s18, %s2233_s18   ;;  %s1693_s17 = sphi %s1736_s17, %s2232_s17   ;;  %s1689_s16 = sphi %s1734_s16, %s2231_s16   ;;  %s1685_s15 = sphi %s1732_s15, %s2230_s15  }
   0x7   : > { %p41_p0 = scmp.ne.s32.totalorder %s1689_s16, %s1685_s15  ;;  %p2214_p1 = scmp.eq.s32.totalorder %s1753_s19, 0 }
   0x8   : > { %p134_p3 = scmp.eq.s32.totalorder %s1023_s20, 1  ;;  %p1024_p5 = scmp.ge.s32.totalorder %s1697_s18, 1 }
   0x9   : > { %p1762_p4 = por %p2214_p1, %p41_p0  ;;  %p141_p7 = scmp.lt.s32.totalorder %s1697_s18, 3 }
   0xa   : > { %p1767_p6 = por %p134_p3, %p41_p0  ;;  %s1699_s24 = smov [#allocation5]  }
   0xb   : > { %s2217_s21 = scalar_select %p1762_p4, 1, 0 }
   0xc   : > { %s2218_s22 = scalar_select %p1767_p6, 1, 0 }
   0xd   : > { %p1772_p8 = pnand %p1024_p5, %p141_p7  ;;  %s159_s25 = sshll.u32 %s1699_s24, 4  ;;  %s1776_s25 = int_to_ptr.vmem [resolvable:$true] %s159_s25 }
   0xe   : > { %s1788_s27 = sadd.s32 1, %s1697_s18   ;;  %s28_s28 = sadd.s32 1, %s1693_s17 }
   0xf   : > { %s2219_s23 = scalar_select %p1772_p8, 1, 0 }
  0x10   : > { %p1511_p9 = pneg %p1772_p8  ;;  %s25_s29 = ssub.s32 %s1697_s18, %s1788_s27 }
  0x11   : > { %s1569_s6 = scalar_lea.hbm %s2212_s3, 2048 }
  0x12   : > { %p1783_p11 = pnand %p1511_p9, %p2214_p1  ;;  %p1570_p12 = scmp.ne.s32.totalorder %s2212_s3, %s1569_s6 }
  0x13   : > { %p1576_p5 = scmp.lt.u32.totalorder %s1569_s6, %s2212_s3 }
  0x14   : > { %p1571_p13 = pneg %p1783_p11 }
  0x16   : > { %p1572_p0 = pnand %p1571_p13, %p1570_p12 }
  0x18   : > { %p1573_p3 = pneg %p1572_p0 }
  0x1a   : > { %p1578_p7 = pnand %p1576_p5, %p1573_p3 }
  0x1c   : > { %1581 = shalt.err (!%p1578_p7)
}
  0x1d   : > { %s1582_s11 = scalar_lea.vmem %s1776_s25, 2048  ;;  %p1590_p2 = scmp.lt.s32.totalorder %s1776_s25, %s1776_s25 }
  0x1e   : > { %p1583_p9 = scmp.ne.s32.totalorder %s1776_s25, %s1582_s11  ;;  %p1591_p6 = scmp.lt.s32.totalorder %s1582_s11, %s1582_s11 }
  0x20   : > { %p1585_p10 = pnand %p1583_p9, %p1571_p13  ;;  %p1592_p4 = por %p1591_p6, %p1590_p2 }
  0x22   : > { %p1586_p1 = pneg %p1585_p10 }
  0x24   : > { %p1593_p8 = pnand %p1592_p4, %p1586_p1 }
  0x26   : > { %1596 = shalt.err (!%p1593_p8)
}
  0x27   : > { %s1700_s12 = smov 128   ;;  %s1701_s13 = smov 8  }
  0x28   : > { %1514 = dma.hbm_to_vmem [thread:$0]  (!%p1783_p11), %s2212_s3, 2048, %s1776_s25, [#allocation6], %s1700_s12, %s1700_s12, %s1701_s13  }
  0x29   : > { %p26_p2 = scmp.eq.s32.totalorder %s25_s29, 0  ;;  %p35_p1 = scmp.ne.s32.totalorder %s1693_s17, %s1689_s16 }
  0x2a   : > { %p36_p4 = scmp.eq.s32.totalorder %s1697_s18, 0  ;;  %p1524_p6 = scmp.lt.s32.totalorder %s1697_s18, 2 }
  0x2b   : > { %s1819_s24 = scalar_select %p26_p2, %s1693_s17, %s28_s28  }
  0x2c   : > { %p37_p8 = por %p36_p4, %p35_p1  ;;  %p2221_p10 = scmp.eq.s32.totalorder %s1753_s19, 1 }
  0x2d   : > { %s173_s5 = sand.u32 1, %s1693_s17   ;;  %s1028_s6 = sshll.u32 %s1697_s18, 7 }
  0x2e   : > { %p1823_p12 = por %p2221_p10, %p35_p1  ;;  %s1027_s7 = sshll.u32 %s173_s5, 3 }
  0x2f   : > { %s1832_s9 = scalar_lea.hbm %s2209_s0, %s1028_s6  ;;  %s177_s25 = scalar_lea.vmem [#allocation2], %s1027_s7 }
  0x30   : > { %s184_s28 = sshll.u32 %s177_s25, 4  ;;  %p1834_p11 = pnand %p1524_p6, %p37_p8  ;;  %s1838_s28 = int_to_ptr.vmem [resolvable:$true] %s184_s28 }
  0x31   : > { %s174_s10 = scalar_lea.sflag [#allocation3], %s173_s5  ;;  %s1597_s11 = scalar_lea.hbm %s1832_s9, 128 }
  0x32   : > { %p1598_p13 = scmp.ne.s32.totalorder %s1832_s9, %s1597_s11  ;;  %p1599_p0 = pneg %p1834_p11 }
  0x33   : > { %s1602_s14 = scalar_lea.hbm %s2209_s0, 256  ;;  %p1603_p7 = scmp.lt.u32.totalorder %s1832_s9, %s2209_s0 }
  0x34   : > { %p1600_p3 = pnand %p1599_p0, %p1598_p13  ;;  %p1604_p9 = scmp.lt.u32.totalorder %s1602_s14, %s1597_s11 }
  0x35   : > { %p1606_p1 = scmp.lt.u32.totalorder %s1597_s11, %s1832_s9 }
  0x36   : > { %p1601_p5 = pneg %p1600_p3  ;;  %p1605_p2 = por %p1604_p9, %p1603_p7 }
  0x38   : > { %p1607_p4 = por %p1606_p1, %p1605_p2 }
  0x3a   : > { %p1608_p6 = pnand %p1607_p4, %p1601_p5 }
  0x3c   : > { %1611 = shalt.err (!%p1608_p6)
}
  0x3d   : > { %s1612_s5 = scalar_lea.vmem %s1838_s28, 128  ;;  %s1702_s7 = smov [#allocation2]  }
  0x3e   : > { %p1613_p8 = scmp.ne.s32.totalorder %s1838_s28, %s1612_s5  ;;  %s1617_s26 = sshll.u32 %s1702_s7, 4  ;;  %s1618_s26 = int_to_ptr.vmem [resolvable:$false] %s1617_s26 }
  0x3f   : > { %s1619_s8 = scalar_lea.vmem %s1618_s26, 256  ;;  %p1620_p3 = scmp.lt.s32.totalorder %s1838_s28, %s1618_s26 }
  0x40   : > { %p1615_p10 = pnand %p1613_p8, %p1599_p0  ;;  %p1621_p7 = scmp.lt.s32.totalorder %s1619_s8, %s1612_s5 }
  0x42   : > { %p1616_p13 = pneg %p1615_p10  ;;  %p1622_p9 = por %p1621_p7, %p1620_p3 }
  0x44   : > { %p1623_p2 = pnand %p1622_p9, %p1616_p13 }
  0x46   : > { %1626 = shalt.err (!%p1623_p2)
}
  0x47   : > { %1518 = dma.hbm_to_vmem [thread:$0]  (!%p1834_p11), %s1832_s9, 128, %s1838_s28, %s174_s10  }
  0x48   : > { %p2224_p5 = scmp.ne.s32.totalorder %s2219_s23, 0 }
  0x49   : > { %s1868_s25 = sand.u32 (!%p2224_p5), 1, %s1689_s16   ;;  %p2225_p0 = scmp.ne.s32.totalorder (!%p2224_p5), %s2217_s21, 0 }
  0x4a   : > { %193 = sbr.rel (%p2224_p5) target bundleno = 598 (0x256), region = 36  ;;  %s1030_s11 = sshll.u32 (!%p2224_p5), %s1868_s25, 3 }
  0x4b   : > { %s196_s12 = scalar_lea.sflag (!%p2224_p5), [#allocation3], %s1868_s25  ;;  %s1874_s13 = scalar_lea.vmem (!%p2224_p5), [#allocation2], %s1030_s11 }
  0x51   : > { %1672 = dma.done.wait (%p2225_p0), %s196_s12, 128  }
  0x52   : > { %1674 = vsyncadd (%p2225_p0), %s196_s12, 4294967168  ;;  %p2226_p11 = scmp.eq.s32.totalorder %s1753_s19, 0 }
  0x54   : > { %1676 = dma.done.wait (%p2226_p11), [#allocation6], 2048   ;;  %p2227_p1 = pmov %p2226_p11 }
  0x55   : > { %v1703_v0 = vmov 0.0|0.0   ;;  %vm1704_vm0 = vmmov 0   ;;  %v1705_v1 = vmov 0.0   ;;  %v237_v2 = vld [vmem:[#allocation5] sm:$0xff]  ;;  %v238_v3 = vld [vmem:[#allocation5 + $0x8] sm:$0xff]  ;;  %v239_v4 = vld [vmem:[#allocation5 + $0x10] sm:$0xff] }
  0x56   : > { %1678 = vsyncadd (%p2227_p1), [#allocation6], 4294965248  ;;  %1350 = vmatprep.subr.bf16.mxu1 %v1703_v0  ;;  %1422 = vmatprep.subr.bf16.mxu0 %v1703_v0  ;;  %v254_v5 = vand.u32 4294901760, %v237_v2  ;;  %v257_v6 = vand.u32 4294901760, %v238_v3  ;;  %v240_v7 = vld [vmem:[#allocation5 + $0x18] sm:$0xff]  ;;  %v260_v8 = vand.u32 4294901760, %v239_v4 }
  0x57   : > { %1172 = vmatprep.mubr.msk.f32.mxu1 %vm1704_vm0, %v1705_v1  ;;  %1277 = vmatprep.mubr.msk.f32.mxu0 %vm1704_vm0, %v1705_v1  ;;  %v263_v9 = vand.u32 4294901760, %v240_v7  ;;  %v241_v10 = vld [vmem:[#allocation5 + $0x20] sm:$0xff]  ;;  %v242_v11 = vld [vmem:[#allocation5 + $0x28] sm:$0xff]  ;;  %v1898_v16 = vld [vmem:[#allocation5 + $0x30] sm:$0xff]  ;;  %vm901_vm2 = vcmask 1040384   ;;  %s1035_s29 = sshll.u32 %s1753_s19, 7 }
  0x58   : > { %v1890_v12 = vpack.c.bf16 %v257_v6, %v254_v5  ;;  %v266_v14 = vand.u32 4294901760, %v241_v10  ;;  %v269_v15 = vand.u32 4294901760, %v242_v11  ;;  %v1900_v17 = vld [vmem:[#allocation5 + $0x38] sm:$0xff]  ;;  %v272_v20 = vand.u32 4294901760, %v1898_v16  ;;  %v1913_v22 = vld [vmem:[#allocation5 + $0x40] sm:$0xff]  ;;  %v1915_v23 = vld [vmem:[#allocation5 + $0x48] sm:$0xff]  ;;  %s2165_s5 = scalar_lea.hbm %s2213_s4, %s1035_s29 }
  0x59   : > { %v1894_v13 = vpack.c.bf16 %v263_v9, %v260_v8  ;;  %v1903_v18 = vld [vmem:[%s1874_s13] sm:$0xff]  ;;  %v275_v21 = vand.u32 4294901760, %v1900_v17  ;;  %v278_v27 = vand.u32 4294901760, %v1913_v22  ;;  %v281_v28 = vand.u32 4294901760, %v1915_v23  ;;  %v1945_v38 = vld [vmem:[#allocation5 + $0x60] sm:$0xff]  ;;  %v1949_v39 = vld [vmem:[#allocation5 + $0x68] sm:$0xff] }
  0x5a   : > { %1352 = vmatpush3.bf16.msra.mxu1 %v1890_v12  ;;  %1424 = vmatpush3.bf16.msra.mxu0 %v1890_v12  ;;  %v1907_v19 = vpack.c.bf16 %v269_v15, %v266_v14  ;;  %v229_v24 = vmul.f32 %v1903_v18, %v1903_v18  ;;  %v1927_v29 = vld [vmem:[#allocation5 + $0x50] sm:$0xff]  ;;  %v1929_v30 = vld [vmem:[#allocation5 + $0x58] sm:$0xff]  ;;  %v1931_v32 = vsub.f32 %v237_v2, %v254_v5  ;;  %v290_v43 = vand.u32 4294901760, %v1945_v38  ;;  %s227_s10 = scalar_lea.vmem [#allocation7], %s1030_s11  ;;  %s930_s7 = scalar_lea.sflag [#allocation4], %s1868_s25 }
  0x5b   : > { %1353 = vmatprep.subr.bf16.mxu1 %v1703_v0  ;;  %1425 = vmatprep.subr.bf16.mxu0 %v1703_v0  ;;  %v1921_v26 = vpack.c.bf16 %v275_v21, %v272_v20  ;;  %v1933_v34 = vsub.f32 %v238_v3, %v257_v6  ;;  %v1941_v35 = vpack.c.bf16 %v281_v28, %v278_v27  ;;  %v284_v36 = vand.u32 4294901760, %v1927_v29  ;;  %v1965_v47 = vld [vmem:[#allocation5 + $0x70] sm:$0xff]  ;;  %v1967_v48 = vld [vmem:[#allocation5 + $0x78] sm:$0xff]  ;;  %s943_s14 = sshll.u32 %s227_s10, 4  ;;  %s1706_s19 = smov [#allocation7]   ;;  %s2167_s14 = int_to_ptr.vmem [resolvable:$true] %s943_s14 }
  0x5c   : > { %v230_v25 = vrot.slane %v229_v24, 4  ;;  %v287_v37 = vand.u32 4294901760, %v1929_v30  ;;  %v1951_v41 = vsub.f32 %v239_v4, %v260_v8  ;;  %v1953_v42 = vsub.f32 %v240_v7, %v263_v9  ;;  %s1627_s26 = scalar_lea.vmem %s2167_s14, 128  ;;  %s1631_s8 = sshll.u32 %s1706_s19, 4  ;;  %s1632_s8 = int_to_ptr.vmem [resolvable:$false] %s1631_s8 }
  0x5d   : > { %v293_v46 = vand.u32 4294901760, %v1949_v39  ;;  %v347_v49 = vand.u32 4294901760, %v1931_v32  ;;  %v354_v50 = vand.u32 4294901760, %v1933_v34  ;;  %v1973_v52 = vsub.f32 %v241_v10, %v266_v14  ;;  %p1628_p4 = scmp.ne.s32.totalorder %s2167_s14, %s1627_s26  ;;  %s1633_s11 = scalar_lea.vmem %s1632_s8, 256 }
  0x5e   : > { %1355 = vmatpush3.bf16.msra.mxu1 %v1894_v13  ;;  %1427 = vmatpush3.bf16.msra.mxu0 %v1894_v13  ;;  %v231_v31 = vadd.f32 %v230_v25, %v229_v24  ;;  %v1962_v45 = vpack.c.bf16 %v287_v37, %v284_v36  ;;  %v1975_v53 = vsub.f32 %v242_v11, %v269_v15  ;;  %v296_v54 = vand.u32 4294901760, %v1965_v47  ;;  %p1634_p10 = scmp.lt.s32.totalorder %s2167_s14, %s1632_s8  ;;  %p1635_p13 = scmp.lt.s32.totalorder %s1633_s11, %s1627_s26 }
  0x5f   : > { %1356 = vmatprep.subr.bf16.mxu1 %v1703_v0  ;;  %1428 = vmatprep.subr.bf16.mxu0 %v1703_v0  ;;  %v299_v55 = vand.u32 4294901760, %v1967_v48  ;;  %v361_v57 = vand.u32 4294901760, %v1951_v41  ;;  %v1988_v58 = vpack.c.bf16 %v293_v46, %v290_v43  ;;  %v348_v59 = vsub.f32 %v1931_v32, %v347_v49  ;;  %p1629_p6 = pnand %p1628_p4, %p1823_p12 }
  0x60   : > { %v232_v33 = vrot.slane %v231_v31, 2  ;;  %v355_v60 = vsub.f32 %v1933_v34, %v354_v50  ;;  %v368_v61 = vand.u32 4294901760, %v1953_v42  ;;  %v1999_v63 = vsub.f32 %v1898_v16, %v272_v20  ;;  %p1636_p3 = por %p1635_p13, %p1634_p10 }
  0x61   : > { %v2002_v2 = vsub.f32 %v1900_v17, %v275_v21  ;;  %v362_v4 = vsub.f32 %v1951_v41, %v361_v57  ;;  %v375_v5 = vand.u32 4294901760, %v1973_v52  ;;  %v382_v6 = vand.u32 4294901760, %v1975_v53  ;;  %p1630_p8 = pneg %p1629_p6 }
  0x62   : > { %1358 = vmatpush3.bf16.msra.mxu1 %v1907_v19  ;;  %1430 = vmatpush3.bf16.msra.mxu0 %v1907_v19  ;;  %v233_v40 = vadd.f32 %v232_v33, %v231_v31  ;;  %v2014_v7 = vpack.c.bf16 %v299_v55, %v296_v54  ;;  %v349_v8 = vand.u32 4294901760, %v348_v59  ;;  %v356_v9 = vand.u32 4294901760, %v355_v60 }
  0x63   : > { %1359 = vmatprep.subr.bf16.mxu1 %v1703_v0  ;;  %1431 = vmatprep.subr.bf16.mxu0 %v1703_v0  ;;  %v369_v10 = vsub.f32 %v1953_v42, %v368_v61  ;;  %v2023_v14 = vsub.f32 %v1913_v22, %v278_v27  ;;  %v2028_v15 = vsub.f32 %v1915_v23, %v281_v28  ;;  %v363_v20 = vand.u32 4294901760, %v362_v4  ;;  %p1637_p7 = pnand %p1636_p3, %p1630_p8 }
  0x64   : > { %v234_v44 = vrot.slane %v233_v40, 1  ;;  %v1447_v16 = vpack.c.bf16 %v354_v50, %v347_v49  ;;  %v376_v21 = vsub.f32 %v1973_v52, %v375_v5  ;;  %v383_v24 = vsub.f32 %v1975_v53, %v382_v6 }
  0x65   : > { %v1375_v25 = vpack.c.bf16 %v356_v9, %v349_v8  ;;  %v370_v31 = vand.u32 4294901760, %v369_v10  ;;  %v389_v22 = vand.u32 4294901760, %v1999_v63  ;;  %v396_v27 = vand.u32 4294901760, %v2002_v2 }
  0x66   : > { %1361 = vmatpush3.bf16.msra.mxu1 %v1921_v26  ;;  %1433 = vmatpush3.bf16.msra.mxu0 %v1921_v26  ;;  %v235_v51 = vadd.f32 %v234_v44, %v233_v40  ;;  %v2041_v23 = vsub.f32 %v1927_v29, %v284_v36  ;;  %v2046_v28 = vsub.f32 %v1929_v30, %v287_v37  ;;  %v377_v40 = vand.u32 4294901760, %v376_v21 }
  0x67   : > { %1362 = vmatprep.subr.bf16.mxu1 %v1703_v0  ;;  %1434 = vmatprep.subr.bf16.mxu0 %v1703_v0  ;;  %v1450_v33 = vpack.c.bf16 %v368_v61, %v361_v57  ;;  %v384_v44 = vand.u32 4294901760, %v383_v24  ;;  %v403_v49 = vand.u32 4294901760, %v2023_v14  ;;  %v1378_v50 = vpack.c.bf16 %v370_v31, %v363_v20 }
  0x68   : > { %v1979_v56 = vand.u32 4294901760, %v235_v51  ;;  %v397_v29 = vsub.f32 %v2002_v2, %v396_v27  ;;  %v410_v36 = vand.u32 4294901760, %v2028_v15  ;;  %v2057_v30 = vsub.f32 %v1945_v38, %v290_v43 }
  0x69   : > { %v2062_v37 = vsub.f32 %v1949_v39, %v293_v46  ;;  %v1453_v57 = vpack.c.bf16 %v382_v6, %v375_v5  ;;  %v404_v59 = vsub.f32 %v2023_v14, %v403_v49  ;;  %v417_v60 = vand.u32 4294901760, %v2041_v23 }
  0x6a   : > { %1364 = vmatpush3.bf16.msra.mxu1 %v1941_v35  ;;  %1436 = vmatpush3.bf16.msra.mxu0 %v1941_v35  ;;  %v1996_v62 = vsub.f32 %v235_v51, %v1979_v56  ;;  %v390_v51 = vsub.f32 %v1999_v63, %v389_v22  ;;  %v424_v61 = vand.u32 4294901760, %v2046_v28  ;;  %v1381_v38 = vpack.c.bf16 %v384_v44, %v377_v40 }
  0x6b   : > { %1365 = vmatprep.subr.bf16.mxu1 %v1703_v0  ;;  %1437 = vmatprep.subr.bf16.mxu0 %v1703_v0  ;;  %v411_v39 = vsub.f32 %v2028_v15, %v410_v36  ;;  %v2077_v46 = vsub.f32 %v1965_v47, %v296_v54  ;;  %v2082_v4 = vsub.f32 %v1967_v48, %v299_v55  ;;  %v405_v6 = vand.u32 4294901760, %v404_v59 }
  0x6c   : > { %v336_v3 = vand.u32 4294901760, %v1996_v62  ;;  %v391_v43 = vand.u32 4294901760, %v390_v51  ;;  %v1456_v5 = vpack.c.bf16 %v396_v27, %v389_v22  ;;  %v418_v8 = vsub.f32 %v2041_v23, %v417_v60 }
  0x6d   : > { %v425_v9 = vsub.f32 %v2046_v28, %v424_v61  ;;  %v438_v47 = vand.u32 4294901760, %v2062_v37  ;;  %v1459_v48 = vpack.c.bf16 %v410_v36, %v403_v49  ;;  %v1462_v22 = vpack.c.bf16 %v424_v61, %v417_v60 }
  0x6e   : > { %1367 = vmatpush3.bf16.msra.mxu1 %v1962_v45  ;;  %1439 = vmatpush3.bf16.msra.mxu0 %v1962_v45  ;;  %v337_v11 = vsub.f32 %v1996_v62, %v336_v3  ;;  %v419_v54 = vand.u32 4294901760, %v418_v8  ;;  %v1399_v59 = vpack.c.bf16 %v1933_v34, %v1931_v32  ;;  %v1402_v60 = vpack.c.bf16 %v1953_v42, %v1951_v41 }
  0x6f   : > { %1368 = vmatprep.subr.bf16.mxu1 %v1703_v0  ;;  %1440 = vmatprep.subr.bf16.mxu0 %v1703_v0  ;;  %v426_v55 = vand.u32 4294901760, %v425_v9  ;;  %v439_v24 = vsub.f32 %v2062_v37, %v438_v47  ;;  %v1405_v32 = vpack.c.bf16 %v1975_v53, %v1973_v52 }
  0x70   : > { %v338_v17 = vand.u32 4294901760, %v337_v11  ;;  %v412_v11 = vand.u32 4294901760, %v411_v39 }
  0x71   : > { %v1390_v31 = vpack.c.bf16 %v426_v55, %v419_v54 }
  0x72   : > { %1370 = vmatpush3.bf16.msra.mxu1 %v1988_v58  ;;  %1442 = vmatpush3.bf16.msra.mxu0 %v1988_v58  ;;  %v1387_v20 = vpack.c.bf16 %v412_v11, %v405_v6 }
  0x73   : > { %1371 = vmatprep.subr.bf16.mxu1 %v1703_v0  ;;  %1443 = vmatprep.subr.bf16.mxu0 %v1703_v0 }
  0x76   : > { %1373 = vmatpush3.bf16.msra.mxu1 %v2014_v7  ;;  %1445 = vmatpush3.bf16.msra.mxu0 %v2014_v7 }
  0x77   : > { %1374 = vmatprep.subr.bf16.mxu1 %v1703_v0  ;;  %1446 = vmatprep.subr.bf16.mxu0 %v1703_v0 }
  0x79   : > { %1173 = vmatmul.mubr.f32.vlgmr.msra.gmra.mrb[0].mxu1 %v338_v17  ;;  %1278 = vmatmul.mubr.f32.vlgmr.msra.gmra.mrb[0].mxu0 %v336_v3  ;;  %v398_v3 = vand.u32 4294901760, %v397_v29  ;;  %v445_v17 = vand.u32 4294901760, %v2077_v46 }
  0x7a   : > { %1376 = vmatpush3.bf16.msra.mxu1 %v1375_v25  ;;  %1448 = vmatpush3.bf16.msra.mxu0 %v1447_v16  ;;  %v431_v16 = vand.u32 4294901760, %v2057_v30  ;;  %v452_v25 = vand.u32 4294901760, %v2082_v4 }
  0x7b   : > { %1377 = vmatprep.subr.bf16.mxu1 %v1703_v0  ;;  %1449 = vmatprep.subr.bf16.mxu0 %v1703_v0  ;;  %v1384_v10 = vpack.c.bf16 %v398_v3, %v391_v43  ;;  %v446_v40 = vsub.f32 %v2077_v46, %v445_v17  ;;  %v1033_v3 = vld [vmem:[%s2211_s2] ss:$0 sm:$0xff] }
  0x7c   : > { %1207 = vmatprep.mubr.msk.f32.mxu1 %vm1704_vm0, %v1705_v1  ;;  %1312 = vmatprep.mubr.msk.f32.mxu0 %vm1704_vm0, %v1705_v1  ;;  %v432_v21 = vsub.f32 %v2057_v30, %v431_v16  ;;  %v453_v44 = vsub.f32 %v2082_v4, %v452_v25 }
  0x7d   : > { %v447_v51 = vand.u32 4294901760, %v446_v40 }
  0x7e   : > { %1379 = vmatpush3.bf16.msra.mxu1 %v1378_v50  ;;  %1451 = vmatpush3.bf16.msra.mxu0 %v1450_v33  ;;  %v433_v27 = vand.u32 4294901760, %v432_v21  ;;  %v440_v33 = vand.u32 4294901760, %v439_v24  ;;  %v1465_v50 = vpack.c.bf16 %v438_v47, %v431_v16  ;;  %v454_v29 = vand.u32 4294901760, %v453_v44 }
  0x7f   : > { %1380 = vmatprep.subr.bf16.mxu1 %v1703_v0  ;;  %1452 = vmatprep.subr.bf16.mxu0 %v1703_v0 }
  0x80   : > { %v1393_v49 = vpack.c.bf16 %v440_v33, %v433_v27  ;;  %v1396_v36 = vpack.c.bf16 %v454_v29, %v447_v51 }
  0x82   : > { %1382 = vmatpush3.bf16.msra.mxu1 %v1381_v38  ;;  %1454 = vmatpush3.bf16.msra.mxu0 %v1453_v57  ;;  %v1468_v57 = vpack.c.bf16 %v452_v25, %v445_v17 }
  0x83   : > { %1383 = vmatprep.subr.bf16.mxu1 %v1703_v0  ;;  %1455 = vmatprep.subr.bf16.mxu0 %v1703_v0 }
  0x86   : > { %1385 = vmatpush3.bf16.msra.mxu1 %v1384_v10  ;;  %1457 = vmatpush3.bf16.msra.mxu0 %v1456_v5 }
  0x87   : > { %1386 = vmatprep.subr.bf16.mxu1 %v1703_v0  ;;  %1458 = vmatprep.subr.bf16.mxu0 %v1703_v0 }
  0x8a   : > { %1388 = vmatpush3.bf16.msra.mxu1 %v1387_v20  ;;  %1460 = vmatpush3.bf16.msra.mxu0 %v1459_v48 }
  0x8b   : > { %1389 = vmatprep.subr.bf16.mxu1 %v1703_v0  ;;  %1461 = vmatprep.subr.bf16.mxu0 %v1703_v0 }
  0x8e   : > { %1391 = vmatpush3.bf16.msra.mxu1 %v1390_v31  ;;  %1463 = vmatpush3.bf16.msra.mxu0 %v1462_v22 }
  0x8f   : > { %1392 = vmatprep.subr.bf16.mxu1 %v1703_v0  ;;  %1464 = vmatprep.subr.bf16.mxu0 %v1703_v0 }
  0x92   : > { %1394 = vmatpush3.bf16.msra.mxu1 %v1393_v49  ;;  %1466 = vmatpush3.bf16.msra.mxu0 %v1465_v50 }
  0x93   : > { %1395 = vmatprep.subr.bf16.mxu1 %v1703_v0  ;;  %1467 = vmatprep.subr.bf16.mxu0 %v1703_v0 }
  0x96   : > { %1397 = vmatpush3.bf16.msra.mxu1 %v1396_v36  ;;  %1469 = vmatpush3.bf16.msra.mxu0 %v1468_v57 }
  0x97   : > { %1398 = vmatprep.subr.bf16.mxu1 %v1703_v0  ;;  %1470 = vmatprep.subr.bf16.mxu0 %v1703_v0 }
  0x99   : > { %1208 = vmatmul.mubr.f32.vlgmr.msra.gmra.mrb[0].mxu1 %v1979_v56  ;;  %1313 = vmatmul.mubr.f32.vlgmr.msra.gmra.mrb[0].mxu0 %v1979_v56 }
  0x9a   : > { %1400 = vmatpush3.bf16.msra.mxu1 %v1399_v59  ;;  %1472 = vmatpush3.bf16.msra.mxu0 %v1890_v12  ;;  %v1408_v12 = vpack.c.bf16 %v2002_v2, %v1999_v63 }
  0x9b   : > { %1401 = vmatprep.subr.bf16.mxu1 %v1703_v0  ;;  %1473 = vmatprep.subr.bf16.mxu0 %v1703_v0 }
  0x9c   : > { %1242 = vmatprep.mubr.msk.f32.mxu1 %vm1704_vm0, %v1705_v1  ;;  %1347 = vmatprep.mubr.msk.f32.mxu0 %vm1704_vm0, %v1705_v1  ;;  %v1411_v1 = vpack.c.bf16 %v2028_v15, %v2023_v14  ;;  %v915_v14 = vlaneseq }
  0x9e   : > { %1403 = vmatpush3.bf16.msra.mxu1 %v1402_v60  ;;  %1475 = vmatpush3.bf16.msra.mxu0 %v1894_v13  ;;  %v1414_v13 = vpack.c.bf16 %v2046_v28, %v2041_v23  ;;  %v916_v15 = vshrl.u32 %v915_v14, 7  ;;  %v910_v28 = vld [vmem:[%s2210_s1] sm:$0x1] }
  0x9f   : > { %1404 = vmatprep.subr.bf16.mxu1 %v1703_v0  ;;  %1476 = vmatprep.subr.bf16.mxu0 %v1703_v0 }
  0xa0   : > { %v917_v61 = vsub.s32 0, %v916_v15 }
  0xa2   : > { %1406 = vmatpush3.bf16.msra.mxu1 %v1405_v32  ;;  %1478 = vmatpush3.bf16.msra.mxu0 %v1907_v19  ;;  %v1417_v19 = vpack.c.bf16 %v2062_v37, %v2057_v30 }
  0xa3   : > { %1407 = vmatprep.subr.bf16.mxu1 %v1703_v0  ;;  %1479 = vmatprep.subr.bf16.mxu0 %v1703_v0 }
  0xa6   : > { %1409 = vmatpush3.bf16.msra.mxu1 %v1408_v12  ;;  %1481 = vmatpush3.bf16.msra.mxu0 %v1921_v26  ;;  %v1420_v26 = vpack.c.bf16 %v2082_v4, %v2077_v46 }
  0xa7   : > { %1410 = vmatprep.subr.bf16.mxu1 %v1703_v0  ;;  %1482 = vmatprep.subr.bf16.mxu0 %v1703_v0 }
  0xaa   : > { %1412 = vmatpush3.bf16.msra.mxu1 %v1411_v1  ;;  %1484 = vmatpush3.bf16.msra.mxu0 %v1941_v35 }
  0xab   : > { %1413 = vmatprep.subr.bf16.mxu1 %v1703_v0  ;;  %1485 = vmatprep.subr.bf16.mxu0 %v1703_v0 }
  0xae   : > { %1415 = vmatpush3.bf16.msra.mxu1 %v1414_v13  ;;  %1487 = vmatpush3.bf16.msra.mxu0 %v1962_v45 }
  0xaf   : > { %1416 = vmatprep.subr.bf16.mxu1 %v1703_v0  ;;  %1488 = vmatprep.subr.bf16.mxu0 %v1703_v0 }
  0xb2   : > { %1418 = vmatpush3.bf16.msra.mxu1 %v1417_v19  ;;  %1490 = vmatpush3.bf16.msra.mxu0 %v1988_v58 }
  0xb3   : > { %1419 = vmatprep.subr.bf16.mxu1 %v1703_v0  ;;  %1491 = vmatprep.subr.bf16.mxu0 %v1703_v0 }
  0xb6   : > { %1421 = vmatpush3.bf16.msra.mxu1 %v1420_v26  ;;  %1493 = vmatpush3.bf16.msra.mxu0 %v2014_v7 }
  0xb9   : > { %1243 = vmatmul.mubr.f32.vlgmr.msra.gmra.mrb[0].mxu1 %v1996_v62  ;;  %1348 = vmatmul.mubr.f32.vlgmr.msra.gmra.mrb[0].mxu0 %v1979_v56 }
 0x18c   : > { %v595_v34 = vpop.f32.mrb[0].mxu1  ;;  %v890_v35 = vpop.f32.mrb[0].mxu0 }
 0x18d   : > { %v1494_v41 = vadd.f32 %v890_v35, %v595_v34  ;;  %v1244_v42 = vpop.f32.mrb[1].mxu1  ;;  %v1349_v45 = vpop.f32.mrb[1].mxu0 }
 0x18f   : > { %1565 = vrsqrt.f32 %v1494_v41  ;;  %vm896_vm1 = vcmp.eq.f32.partialorder %v1494_v41, inf  ;;  %v899_v58 = vand.u32 2147483648, %v1494_v41  ;;  %vm898_vm3 = vcmp.eq.f32.partialorder %v1494_v41, 0.0 }
 0x199   : > { %v1566_v52 = vpop.eup %1565 }
 0x19a   : > { %v895_v53 = vmul.f32 %v1566_v52, %v1494_v41 }
 0x19c   : > { %v897_v63 = vsel %vm896_vm1, %v1494_v41, %v895_v53 }
 0x19d   : > { %v900_v0 = vsel %vm898_vm3, %v899_v58, %v897_v63 }
 0x19e   : > { %v902_v2 = vsel %vm901_vm2, %v900_v0, 0.0 }
 0x19f   : > { %903 = vadd.xlane.f32.xlu0 %v902_v2 }
 0x22c   : > { %v904_v62 = vpop.xlane.xlu0 %903 }
 0x22d   : > { %v906_v56 = vmul.f32 0.0078125, %v904_v62 }
 0x22f   : > { %v907_v7 = vadd.f32 1e-06, %v906_v56 }
 0x231   : > { %1567 = vrcp.f32 %v907_v7 }
 0x23b   : > { %v1568_v23 = vpop.eup %1567 }
 0x23c   : > { %v909_v30 = vmul.f32 %v1568_v23, %v900_v0 }
 0x23e   : > { %v911_v37 = vmul.f32 %v910_v28, %v909_v30 }
 0x240   : > { %v912_v38 = vadd.f32 1.0, %v911_v37 }
 0x242   : > { %v918_v43 = vrot.slane %v912_v38, %v917_v61 }
 0x244   : > { %v920_v39 = vmul.f32 %v918_v43, %v1903_v18 }
 0x246   : > { %v927_v46 = vadd.f32 %v1033_v3, %v920_v39 }
 0x248   : > { %928 = vst [vmem:[%s227_s10] sm:$0xff] %v927_v46 }
 0x249   : > { %1640 = shalt.err (!%p1637_p7)
}
 0x24a   : > { %s1641_s25 = scalar_lea.hbm %s2165_s5, 128  ;;  %s1645_s21 = scalar_lea.hbm %s2213_s4, 256 }
 0x24b   : > { %p1642_p9 = scmp.ne.s32.totalorder %s2165_s5, %s1641_s25  ;;  %p1646_p0 = scmp.lt.u32.totalorder %s2165_s5, %s2213_s4 }
 0x24c   : > { %p1647_p11 = scmp.lt.u32.totalorder %s1645_s21, %s1641_s25  ;;  %p1649_p4 = scmp.lt.u32.totalorder %s1641_s25, %s2165_s5 }
 0x24d   : > { %p1643_p2 = pnand %p1642_p9, %p1823_p12 }
 0x24e   : > { %p1648_p1 = por %p1647_p11, %p1646_p0 }
 0x24f   : > { %p1644_p5 = pneg %p1643_p2 }
 0x250   : > { %p1650_p6 = por %p1649_p4, %p1648_p1 }
 0x252   : > { %p1651_p8 = pnand %p1650_p6, %p1644_p5 }
 0x254   : > { %1654 = shalt.err (!%p1651_p8)
}
 0x255   : > { %1509 = dma.vmem_to_hbm [thread:$0]  (%p1823_p12), %s2167_s14, 128, %s2165_s5, %s930_s7  }
 0x256 PF: > { %s955_s28 = sand.u32 1, %s1685_s15   ;;  %p2228_p10 = scmp.ne.s32.totalorder %s2218_s22, 0 }
 0x257   : > { %p2229_p13 = scmp.ge.s32.totalorder %s1697_s18, 2  ;;  %s956_s29 = scalar_lea.sflag [#allocation4], %s955_s28 }
 0x259   : > { %p1520_p3 = pnand %p2229_p13, %p2228_p10 }
 0x25b   : > { %1680 = dma.done.wait (!%p1520_p3), %s956_s29, 128  }
 0x25c   : > { %1682 = vsyncadd (!%p1520_p3), %s956_s29, 4294967168  ;;  %p18_p7 = scmp.ge.s32.totalorder %s1788_s27, 4   ;;  %s2230_s15 = smov %s1689_s16 }
 0x25d   : > { %s2231_s16 = smov %s1693_s17  ;;  %s2232_s17 = smov %s1819_s24 }
 0x25e   : > { %s2233_s18 = smov %s1788_s27  ;;  %20 = sbr.rel (!%p18_p7) target bundleno = 6 (0x6), region = 85 }
 0x265   :  { %961 = vsyncpa [#allocation3], 1 }
 0x266   :  { %963 = vsyncpa [#allocation3 + $0x1], 1 }
 0x267   :  { %964 = vsyncpa [#allocation6], 1 }
 0x268   :  { %965 = vsyncpa [#allocation4], 1 }
 0x269   :  { %967 = vsyncpa [#allocation4 + $0x1], 1 }

</bundles_post_ra>
